<compile_context>
chip_gen: v6e
topology: v6e:2x2x1
jax: 0.10.0
libtpu: 0.0.40
codegen_flags: <defaults>
</compile_context>

<pallas_src>
import jax
import jax.numpy as jnp
from jax import lax
from jax.experimental import pallas as pl
from jax.experimental.pallas import tpu as pltpu


def _mish_ref(v):
    # mish(x) = x * tanh(softplus(x)); stable form used on the XLA side.
    return v * jnp.tanh(jnp.logaddexp(v, 0.0))


def _round_up(n, m):
    return ((n + m - 1) // m) * m


def make_kernel(*, K, gs, pad, H, Lt, c_out, add_conv_bias, identity_res,
                matmul_dtype, eps):
    """Fused kernel for one batch tile laid out as (channels, Lt lanes)."""
    C = c_out
    f32 = jnp.float32
    md = matmul_dtype

    def mish(v):
        # Single-exp Mish: with e = exp(x), tanh(softplus(x)) = (e^2+2e)/(e^2+2e+2).
        # Clamp the exp argument (for x > 20 the factor is 1.0 in f32 anyway).
        e = jnp.exp(jnp.minimum(v, 20.0))
        p = e * (e + 2.0)
        return v * (p / (p + 2.0))

    def roll_plus(a, d):
        # result[:, l] = a[:, l + d]. pltpu.roll follows jnp.roll semantics
        # (roll(a, s)[l] = a[l - s]) => shift = (-d) mod Lt.   (Sign-fix.)
        s = (-d) % Lt
        if s == 0:
            return a
        return pltpu.roll(a, shift=s, axis=1)

    def im2col(a):
        # stacked[k*rows + r, l] = a[r, l + k - pad]; circular wrap only ever
        # reads pad/tail lanes, which are exactly zero by construction.
        return jnp.concatenate([roll_plus(a, k - pad) for k in range(K)], axis=0)

    def kernel(*refs):
        it = iter(refs)
        x_ref = next(it)          # (1, c_in_p, Lt)  f32
        tproj_ref = next(it)      # (1, C, Tb)       f32
        S_ref = next(it)          # (Lt, Tb)  lane -> element indicator (0 at pad lanes)
        ST_ref = next(it)         # (Tb, Lt)
        w1_ref = next(it)         # (C, K*c_in_p)    matmul_dtype
        w2_ref = next(it)         # (C, K*C)         matmul_dtype
        pv_ref = next(it)         # (C, 8) packed per-channel vectors (f32)
        if gs > 1:
            GI_ref = next(it)     # (G, C)
            GIT_ref = next(it)    # (C, G)
        if not identity_res:
            wr_ref = next(it)     # (C, c_in_p)      matmul_dtype
        out_ref = next(it)        # (1, C, Lt)

        S = S_ref[...]
        ST = ST_ref[...]
        pv = pv_ref[...]
        b1, g1, be1 = pv[:, 0:1], pv[:, 1:2], pv[:, 2:3]
        b2, g2, be2 = pv[:, 3:4], pv[:, 4:5], pv[:, 5:6]
        br = pv[:, 6:7]

        def gn_mish(h, gamma, beta):
            # h: (C, Lt) f32.  Per-(group, element) stats via masked indicator matmuls.
            m = jnp.dot(jnp.concatenate([h, h * h], axis=0), S,
                        preferred_element_type=f32)                  # (2C, Tb)
            s1, s2 = m[:C], m[C:]
            if gs > 1:
                GI = GI_ref[...]
                s1 = jnp.dot(GI, s1, preferred_element_type=f32)      # (G, Tb)
                s2 = jnp.dot(GI, s2, preferred_element_type=f32)
            n = float(gs * H)
            mean = s1 / n
            var = jnp.maximum(s2 / n - mean * mean, 0.0)              # clamp cancellation
            inv = lax.rsqrt(var + eps)
            if gs > 1:
                GIT = GIT_ref[...]
                mean = jnp.dot(GIT, mean, preferred_element_type=f32)
                inv = jnp.dot(GIT, inv, preferred_element_type=f32)
            a_cb = gamma * inv                                        # (C, Tb)
            b_cb = beta - gamma * mean * inv
            ab = jnp.dot(jnp.concatenate([a_cb, b_cb], axis=0), ST,
                         preferred_element_type=f32)                  # (2C, Lt); 0 at pad lanes
            return mish(h * ab[:C] + ab[C:])                          # mish(0) == 0

        x = x_ref[0]                                                  # (c_in_p, Lt) f32

        # --- blocks[0]: conv (in-kernel im2col -> one MXU matmul) -> GN -> Mish ---
        h1 = jnp.dot(w1_ref[...], im2col(x).astype(md),
                     preferred_element_type=f32)                      # (C, Lt)
        if add_conv_bias:
            h1 = h1 + b1
        h1 = gn_mish(h1, g1, be1)

        # --- time embedding (projected in the wrapper), broadcast over lanes ---
        out1 = h1 + jnp.dot(tproj_ref[0], ST, preferred_element_type=f32)

        # --- blocks[1]: conv -> GN -> Mish (pad lanes of out1 are exact zeros) ---
        h2 = jnp.dot(w2_ref[...], im2col(out1).astype(md),
                     preferred_element_type=f32)
        if add_conv_bias:
            h2 = h2 + b2
        h2 = gn_mish(h2, g2, be2)

        # --- residual: identity (no matmul, no weight DMA) or 1x1 conv ---
        if identity_res:
            res = x[:C]
        else:
            res = jnp.dot(wr_ref[...], x.astype(md),
                          preferred_element_type=f32) + br
        out_ref[0] = (h2 + res).astype(out_ref.dtype)

    return kernel


def resnet1d_block(x, t_embed, params, *, kernel_size, n_groups, eps=1e-5,
                   batch_tile=None, matmul_dtype=jnp.bfloat16, lane_target=512):
    """x: (B, c_in, H); t_embed: (B, t_dim). Returns (B, c_out, H) float32.

    params: w1,b1,g1,beta1, w2,b2,g2,beta2, wt,bt, and (when c_in != c_out) wr,br.
    """
    f32 = jnp.float32
    B, c_in, H = x.shape
    c_out = params['w1'].shape[0]
    assert c_out % n_groups == 0
    gs = c_out // n_groups
    K = kernel_size
    pad = K // 2
    Hp = H + 2 * pad

    # Batch tile: aim for lane_target lanes per step (per-step overhead ~0.35us),
    # but cap Tb so the GN indicator matmuls (O(C*Lt*Tb)) stay below the conv
    # matmuls (O(C*K*C*Lt)) and S/ST stay small in VMEM.
    if batch_tile is not None:
        Tb = max(1, min(batch_tile, B))
    else:
        Tb = max(1, min(B, lane_target // Hp))
        Tb = min(Tb, max(8, (K * c_out) // 2), 64)
    n_tiles = -(-B // Tb)
    B_pad = n_tiles * Tb
    Lt = _round_up(Tb * Hp, 128)          # lane-dense (>=128, multiple of 128)

    x = x.astype(f32)
    t_embed = t_embed.astype(f32)

    # Pad input channels to a multiple of 8 so in-kernel sublane concats are aligned.
    # TODO(synk): also pad c_out to a multiple of 8 for odd channel counts (all
    # channel counts used by this model are already multiples of 8).
    c_in_p = _round_up(c_in, 8)
    if c_in_p != c_in:
        x = jnp.pad(x, ((0, 0), (0, c_in_p - c_in), (0, 0)))

    # ---- lane layout: element e of a tile occupies lanes [e*Hp, (e+1)*Hp),
    #      real samples at [e*Hp+pad, e*Hp+pad+H), 'same' conv pad zeros included.
    x_p = jnp.pad(x, ((0, B_pad - B), (0, 0), (pad, pad)))            # (B_pad, c_in_p, Hp)
    x_t = (x_p.reshape(n_tiles, Tb, c_in_p, Hp)
               .transpose(0, 2, 1, 3)
               .reshape(n_tiles, c_in_p, Tb * Hp))
    x_t = jnp.pad(x_t, ((0, 0), (0, 0), (0, Lt - Tb * Hp)))           # (n_tiles, c_in_p, Lt)

    # time MLP (Mish -> Linear) hoisted to XLA; kernel only broadcasts + adds.
    tproj = _mish_ref(t_embed) @ params['wt'].astype(f32).T + params['bt'].astype(f32)
    tproj = jnp.pad(tproj, ((0, B_pad - B), (0, 0)))
    tproj_t = tproj.reshape(n_tiles, Tb, c_out).transpose(0, 2, 1)    # (n_tiles, c_out, Tb)

    # lane <-> element indicator (shared across tiles); 0 at pad + tail lanes.
    lane = jnp.arange(Lt)
    e_idx = lane // Hp
    p_idx = lane % Hp
    valid = (lane < Tb * Hp) & (p_idx >= pad) & (p_idx < pad + H)
    S = (valid[:, None] & (e_idx[:, None] == jnp.arange(Tb)[None, :])).astype(f32)
    ST = S.T

    # weight repack for the single im2col matmul: row index = k*c_in + ci.
    w1p = jnp.pad(params['w1'].astype(f32), ((0, 0), (0, c_in_p - c_in), (0, 0)))
    w1f = w1p.transpose(0, 2, 1).reshape(c_out, K * c_in_p).astype(matmul_dtype)
    w2f = (params['w2'].astype(f32).transpose(0, 2, 1)
           .reshape(c_out, K * c_out).astype(matmul_dtype))

    identity_res = 'wr' not in params
    vec = lambda name: (params[name].astype(f32) if name in params
                        else jnp.zeros((c_out,), f32))
    pvec = jnp.stack([vec('b1'), vec('g1'), vec('beta1'),
                      vec('b2'), vec('g2'), vec('beta2'),
                      vec('br'), jnp.zeros((c_out,), f32)], axis=1)    # (c_out, 8)

    args = [x_t, tproj_t, S, ST, w1f, w2f, pvec]
    if gs > 1:
        ch = jnp.arange(c_out)
        GI = (ch[None, :] // gs == jnp.arange(n_groups)[:, None]).astype(f32)  # (G, C)
        args += [GI, GI.T]
    if not identity_res:
        wrf = jnp.pad(params['wr'].astype(f32)[:, :, 0],
                      ((0, 0), (0, c_in_p - c_in))).astype(matmul_dtype)
        args += [wrf]

    def tiled_spec(a):
        return pl.BlockSpec((1,) + a.shape[1:], lambda i: (i, 0, 0))

    def const_spec(a):
        nd = a.ndim
        return pl.BlockSpec(a.shape, lambda i, _nd=nd: (0,) * _nd)

    in_specs = [tiled_spec(x_t), tiled_spec(tproj_t)] + [const_spec(a) for a in args[2:]]
    out_specs = pl.BlockSpec((1, c_out, Lt), lambda i: (i, 0, 0))

    kernel = make_kernel(K=K, gs=gs, pad=pad, H=H, Lt=Lt, c_out=c_out,
                         add_conv_bias=(gs != 1), identity_res=identity_res,
                         matmul_dtype=matmul_dtype, eps=eps)

    # Advisory cost estimate for XLA's scheduler.
    flops_tile = (2 * c_out * Lt * (K * c_in_p + K * c_out
                                    + (0 if identity_res else c_in_p))
                  + 8 * c_out * Lt * Tb)                   # conv/res + GN indicator matmuls
    bytes_tile = 4 * Lt * (c_in_p + c_out) + 4 * c_out * Tb
    cost = pl.CostEstimate(
        flops=int(n_tiles * flops_tile),
        transcendentals=int(n_tiles * 2 * c_out * Lt),
        bytes_accessed=int(n_tiles * bytes_tile + sum(4 * int(a.size) for a in args[2:])))

    out_t = pl.pallas_call(
        kernel,
        out_shape=jax.ShapeDtypeStruct((n_tiles, c_out, Lt), f32),
        grid=(n_tiles,),
        in_specs=in_specs,
        out_specs=out_specs,
        compiler_params=pltpu.CompilerParams(
            dimension_semantics=("parallel",),          # batch tiles independent (v7x 2 TCs)
            vmem_limit_bytes=48 * 1024 * 1024),         # explicit limit (v7x: 64 MiB VMEM)
        cost_estimate=cost,
    )(*args)

    # unpack lane layout back to (B, c_out, H) in XLA
    out = (out_t[:, :, :Tb * Hp]
           .reshape(n_tiles, c_out, Tb, Hp)[:, :, :, pad:pad + H]
           .transpose(0, 2, 1, 3)
           .reshape(B_pad, c_out, H))[:B]
    return out


def ref_forward(x, t_embed, params, *, kernel_size, n_groups, eps=1e-5):
    """Pure-JAX reference mirroring the PyTorch semantics."""
    def conv(xv, w, b, pad):
        y = lax.conv_general_dilated(xv, w, (1,), [(pad, pad)],
                                     dimension_numbers=('NCH', 'OIH', 'NCH'))
        return y + b[None, :, None]

    def gn(h, gamma, beta):
        B, C, H = h.shape
        hg = h.reshape(B, n_groups, C // n_groups, H)
        mean = hg.mean(axis=(2, 3), keepdims=True)
        var = hg.var(axis=(2, 3), keepdims=True)
        hn = ((hg - mean) / jnp.sqrt(var + eps)).reshape(B, C, H)
        return hn * gamma[None, :, None] + beta[None, :, None]

    pad = kernel_size // 2
    h1 = _mish_ref(gn(conv(x, params['w1'], params['b1'], pad),
                      params['g1'], params['beta1']))
    tproj = _mish_ref(t_embed) @ params['wt'].T + params['bt']
    out1 = h1 + tproj[:, :, None]
    h2 = _mish_ref(gn(conv(out1, params['w2'], params['b2'], pad),
                      params['g2'], params['beta2']))
    res = conv(x, params['wr'], params['br'], 0) if 'wr' in params else x
    return h2 + res


if __name__ == "__main__":
    f32 = jnp.float32

    def make_params(key, c_in, c_out, t_dim, K, with_residual):
        ks = jax.random.split(key, 12)
        p = {
            'w1': 0.1 * jax.random.normal(ks[0], (c_out, c_in, K), f32),
            'b1': 0.1 * jax.random.normal(ks[1], (c_out,), f32),
            'g1': 1.0 + 0.1 * jax.random.normal(ks[2], (c_out,), f32),
            'beta1': 0.1 * jax.random.normal(ks[3], (c_out,), f32),
            'w2': 0.1 * jax.random.normal(ks[4], (c_out, c_out, K), f32),
            'b2': 0.1 * jax.random.normal(ks[5], (c_out,), f32),
            'g2': 1.0 + 0.1 * jax.random.normal(ks[6], (c_out,), f32),
            'beta2': 0.1 * jax.random.normal(ks[7], (c_out,), f32),
            'wt': 0.1 * jax.random.normal(ks[8], (c_out, t_dim), f32),
            'bt': 0.1 * jax.random.normal(ks[9], (c_out,), f32),
        }
        if with_residual:
            p['wr'] = 0.1 * jax.random.normal(ks[10], (c_out, c_in, 1), f32)
            p['br'] = 0.1 * jax.random.normal(ks[11], (c_out,), f32)
        return p

    root = jax.random.PRNGKey(0)

    configs = [
        # (B, c_in, c_out, H, t_dim, K, n_groups, batch_tile)
        (2, 4, 8, 16, 16, 5, 8, None),     # group size 1, residual conv, single tile
        (3, 4, 16, 16, 16, 5, 8, 2),       # group size 2, residual conv, 2 tiles + batch pad
        (2, 16, 16, 24, 12, 3, 8, None),   # identity residual (c_in == c_out), gs=2
    ]

    for ci, (B, c_in, c_out, H, t_dim, K, n_groups, batch_tile) in enumerate(configs):
        kp, kx, kt = jax.random.split(jax.random.fold_in(root, ci), 3)
        params = make_params(kp, c_in, c_out, t_dim, K, with_residual=(c_in != c_out))
        x = jax.random.normal(kx, (B, c_in, H), f32)
        t_embed = jax.random.normal(kt, (B, t_dim), f32)

        out = resnet1d_block(x, t_embed, params, kernel_size=K, n_groups=n_groups,
                             batch_tile=batch_tile, matmul_dtype=jnp.float32)
        out = jax.block_until_ready(out)
        ref = ref_forward(x, t_embed, params, kernel_size=K, n_groups=n_groups)
        assert out.shape == (B, c_out, H)
        err = float(jnp.max(jnp.abs(out - ref)))
        assert jnp.allclose(out, ref, atol=2e-3, rtol=2e-3), (ci, err)

    # Default bf16 MXU operands (v6e / v7x): f32 accumulation, f32 GN/Mish stats.
    B, c_in, c_out, H, t_dim, K, n_groups, _ = configs[1]
    kp, kx, kt = jax.random.split(jax.random.fold_in(root, 1), 3)
    params = make_params(kp, c_in, c_out, t_dim, K, with_residual=True)
    x = jax.random.normal(kx, (B, c_in, H), f32)
    t_embed = jax.random.normal(kt, (B, t_dim), f32)
    out_bf16 = jax.block_until_ready(
        resnet1d_block(x, t_embed, params, kernel_size=K, n_groups=n_groups))
    ref = ref_forward(x, t_embed, params, kernel_size=K, n_groups=n_groups)
    err = float(jnp.max(jnp.abs(out_bf16 - ref)))
    assert jnp.allclose(out_bf16, ref, atol=8e-2, rtol=8e-2), err

    print("KERNEL_OK")
</pallas_src>

<mosaic_0001>
module attributes {stable_mosaic.version = 11 : i64} {
  func.func @kernel(%arg0: i32, %arg1: memref<1x8x128xf32, #tpu.memory_space<vmem>>, %arg2: memref<1x8x2xf32, #tpu.memory_space<vmem>>, %arg3: memref<128x2xf32, #tpu.memory_space<vmem>>, %arg4: memref<2x128xf32, #tpu.memory_space<vmem>>, %arg5: memref<8x40xf32, #tpu.memory_space<vmem>>, %arg6: memref<8x40xf32, #tpu.memory_space<vmem>>, %arg7: memref<8x8xf32, #tpu.memory_space<vmem>>, %arg8: memref<8x8xf32, #tpu.memory_space<vmem>>, %arg9: memref<1x8x128xf32, #tpu.memory_space<vmem>>) attributes {dimension_semantics = [#tpu.dimension_semantics<parallel>], iteration_bounds = array<i64: 1>, scalar_prefetch = 0 : i64, scratch_operands = 0 : i64, tpu.core_type = #tpu.core_type<tc>, window_params = [{transform_indices = @transform_0, window_bounds = array<i64: 1, 8, 128>}, {transform_indices = @transform_1, window_bounds = array<i64: 1, 8, 2>}, {pipeline_mode = #tpu.pipeline_mode<synchronous>, transform_indices = @transform_2, window_bounds = array<i64: 128, 2>}, {pipeline_mode = #tpu.pipeline_mode<synchronous>, transform_indices = @transform_3, window_bounds = array<i64: 2, 128>}, {pipeline_mode = #tpu.pipeline_mode<synchronous>, transform_indices = @transform_4, window_bounds = array<i64: 8, 40>}, {pipeline_mode = #tpu.pipeline_mode<synchronous>, transform_indices = @transform_5, window_bounds = array<i64: 8, 40>}, {pipeline_mode = #tpu.pipeline_mode<synchronous>, transform_indices = @transform_6, window_bounds = array<i64: 8, 8>}, {pipeline_mode = #tpu.pipeline_mode<synchronous>, transform_indices = @transform_7, window_bounds = array<i64: 8, 8>}, {transform_indices = @transform_8, window_bounds = array<i64: 1, 8, 128>}]} {
    %c0 = arith.constant 0 : index
    %c0_0 = arith.constant 0 : index
    %0 = vector.load %arg3[%c0, %c0_0] : memref<128x2xf32, #tpu.memory_space<vmem>>, vector<128x2xf32>
    %c0_1 = arith.constant 0 : index
    %c0_2 = arith.constant 0 : index
    %1 = vector.load %arg4[%c0_1, %c0_2] : memref<2x128xf32, #tpu.memory_space<vmem>>, vector<2x128xf32>
    %c0_3 = arith.constant 0 : index
    %c0_4 = arith.constant 0 : index
    %2 = vector.load %arg7[%c0_3, %c0_4] : memref<8x8xf32, #tpu.memory_space<vmem>>, vector<8x8xf32>
    %3 = vector.extract_strided_slice %2 {offsets = [0, 1], sizes = [8, 1], strides = [1, 1]} : vector<8x8xf32> to vector<8x1xf32>
    %4 = vector.extract_strided_slice %2 {offsets = [0, 2], sizes = [8, 1], strides = [1, 1]} : vector<8x8xf32> to vector<8x1xf32>
    %5 = vector.extract_strided_slice %2 {offsets = [0, 4], sizes = [8, 1], strides = [1, 1]} : vector<8x8xf32> to vector<8x1xf32>
    %6 = vector.extract_strided_slice %2 {offsets = [0, 5], sizes = [8, 1], strides = [1, 1]} : vector<8x8xf32> to vector<8x1xf32>
    %7 = vector.extract_strided_slice %2 {offsets = [0, 6], sizes = [8, 1], strides = [1, 1]} : vector<8x8xf32> to vector<8x1xf32>
    %c0_5 = arith.constant 0 : index
    %c0_6 = arith.constant 0 : index
    %c0_7 = arith.constant 0 : index
    %8 = vector.load %arg1[%c0_5, %c0_6, %c0_7] : memref<1x8x128xf32, #tpu.memory_space<vmem>>, vector<1x8x128xf32>
    %9 = vector.shape_cast %8 : vector<1x8x128xf32> to vector<8x128xf32>
    %c0_8 = arith.constant 0 : index
    %c0_9 = arith.constant 0 : index
    %10 = vector.load %arg5[%c0_8, %c0_9] : memref<8x40xf32, #tpu.memory_space<vmem>>, vector<8x40xf32>
    %c2_i32 = arith.constant 2 : i32
    %11 = tpu.dynamic_rotate %9 by %c2_i32 dim 1 : vector<8x128xf32>, i32 -> vector<8x128xf32>
    %c1_i32 = arith.constant 1 : i32
    %12 = tpu.dynamic_rotate %9 by %c1_i32 dim 1 : vector<8x128xf32>, i32 -> vector<8x128xf32>
    %c127_i32 = arith.constant 127 : i32
    %13 = tpu.dynamic_rotate %9 by %c127_i32 dim 1 : vector<8x128xf32>, i32 -> vector<8x128xf32>
    %c126_i32 = arith.constant 126 : i32
    %14 = tpu.dynamic_rotate %9 by %c126_i32 dim 1 : vector<8x128xf32>, i32 -> vector<8x128xf32>
    %15 = tpu.concatenate %11, %12, %9, %13, %14 in 0 : vector<8x128xf32>, vector<8x128xf32>, vector<8x128xf32>, vector<8x128xf32>, vector<8x128xf32> -> vector<40x128xf32>
    %cst = arith.constant dense<0.000000e+00> : vector<8x128xf32>
    %16 = tpu.matmul %10, %15, %cst {dimension_numbers = #tpu.dot_dimension_numbers<[1], [0], [0], [1], [0, 0, 1, 1], [], []>} : vector<8x40xf32>, vector<40x128xf32>, vector<8x128xf32> -> vector<8x128xf32>
    %17 = arith.mulf %16, %16 : vector<8x128xf32>
    %18 = tpu.concatenate %16, %17 in 0 : vector<8x128xf32>, vector<8x128xf32> -> vector<16x128xf32>
    %cst_10 = arith.constant dense<0.000000e+00> : vector<16x2xf32>
    %19 = tpu.matmul %18, %0, %cst_10 {dimension_numbers = #tpu.dot_dimension_numbers<[1], [0], [0], [1], [0, 0, 1, 1], [], []>} : vector<16x128xf32>, vector<128x2xf32>, vector<16x2xf32> -> vector<16x2xf32>
    %20 = vector.extract_strided_slice %19 {offsets = [0, 0], sizes = [8, 2], strides = [1, 1]} : vector<16x2xf32> to vector<8x2xf32>
    %21 = vector.extract_strided_slice %19 {offsets = [8, 0], sizes = [8, 2], strides = [1, 1]} : vector<16x2xf32> to vector<8x2xf32>
    %cst_11 = arith.constant 1.600000e+01 : f32
    %22 = vector.broadcast %cst_11 : f32 to vector<8x2xf32>
    %23 = arith.divf %20, %22 : vector<8x2xf32>
    %cst_12 = arith.constant 1.600000e+01 : f32
    %24 = vector.broadcast %cst_12 : f32 to vector<8x2xf32>
    %25 = arith.divf %21, %24 : vector<8x2xf32>
    %26 = arith.mulf %23, %23 : vector<8x2xf32>
    %27 = arith.subf %25, %26 : vector<8x2xf32>
    %cst_13 = arith.constant 0.000000e+00 : f32
    %28 = vector.broadcast %cst_13 : f32 to vector<8x2xf32>
    %29 = arith.maximumf %27, %28 : vector<8x2xf32>
    %cst_14 = arith.constant 9.99999974E-6 : f32
    %30 = vector.broadcast %cst_14 : f32 to vector<8x2xf32>
    %31 = arith.addf %29, %30 : vector<8x2xf32>
    %32 = math.rsqrt %31 : vector<8x2xf32>
    %33 = vector.broadcast %3 : vector<8x1xf32> to vector<8x2xf32>
    %34 = arith.mulf %33, %32 : vector<8x2xf32>
    %35 = vector.broadcast %3 : vector<8x1xf32> to vector<8x2xf32>
    %36 = arith.mulf %35, %23 : vector<8x2xf32>
    %37 = arith.mulf %36, %32 : vector<8x2xf32>
    %38 = vector.broadcast %4 : vector<8x1xf32> to vector<8x2xf32>
    %39 = arith.subf %38, %37 : vector<8x2xf32>
    %40 = tpu.concatenate %34, %39 in 0 : vector<8x2xf32>, vector<8x2xf32> -> vector<16x2xf32>
    %cst_15 = arith.constant dense<0.000000e+00> : vector<16x128xf32>
    %41 = tpu.matmul %40, %1, %cst_15 {dimension_numbers = #tpu.dot_dimension_numbers<[1], [0], [0], [1], [0, 0, 1, 1], [], []>} : vector<16x2xf32>, vector<2x128xf32>, vector<16x128xf32> -> vector<16x128xf32>
    %42 = vector.extract_strided_slice %41 {offsets = [0, 0], sizes = [8, 128], strides = [1, 1]} : vector<16x128xf32> to vector<8x128xf32>
    %43 = arith.mulf %16, %42 : vector<8x128xf32>
    %44 = vector.extract_strided_slice %41 {offsets = [8, 0], sizes = [8, 128], strides = [1, 1]} : vector<16x128xf32> to vector<8x128xf32>
    %45 = arith.addf %43, %44 : vector<8x128xf32>
    %cst_16 = arith.constant 2.000000e+01 : f32
    %46 = vector.broadcast %cst_16 : f32 to vector<8x128xf32>
    %47 = arith.minimumf %45, %46 : vector<8x128xf32>
    %48 = math.exp %47 : vector<8x128xf32>
    %cst_17 = arith.constant 2.000000e+00 : f32
    %49 = vector.broadcast %cst_17 : f32 to vector<8x128xf32>
    %50 = arith.addf %48, %49 : vector<8x128xf32>
    %51 = arith.mulf %48, %50 : vector<8x128xf32>
    %cst_18 = arith.constant 2.000000e+00 : f32
    %52 = vector.broadcast %cst_18 : f32 to vector<8x128xf32>
    %53 = arith.addf %51, %52 : vector<8x128xf32>
    %54 = arith.divf %51, %53 : vector<8x128xf32>
    %55 = arith.mulf %45, %54 : vector<8x128xf32>
    %c0_19 = arith.constant 0 : index
    %c0_20 = arith.constant 0 : index
    %c0_21 = arith.constant 0 : index
    %56 = vector.load %arg2[%c0_19, %c0_20, %c0_21] : memref<1x8x2xf32, #tpu.memory_space<vmem>>, vector<1x8x2xf32>
    %57 = vector.shape_cast %56 : vector<1x8x2xf32> to vector<8x2xf32>
    %cst_22 = arith.constant dense<0.000000e+00> : vector<8x128xf32>
    %58 = tpu.matmul %57, %1, %cst_22 {dimension_numbers = #tpu.dot_dimension_numbers<[1], [0], [0], [1], [0, 0, 1, 1], [], []>} : vector<8x2xf32>, vector<2x128xf32>, vector<8x128xf32> -> vector<8x128xf32>
    %59 = arith.addf %55, %58 : vector<8x128xf32>
    %c0_23 = arith.constant 0 : index
    %c0_24 = arith.constant 0 : index
    %60 = vector.load %arg6[%c0_23, %c0_24] : memref<8x40xf32, #tpu.memory_space<vmem>>, vector<8x40xf32>
    %c2_i32_25 = arith.constant 2 : i32
    %61 = tpu.dynamic_rotate %59 by %c2_i32_25 dim 1 : vector<8x128xf32>, i32 -> vector<8x128xf32>
    %c1_i32_26 = arith.constant 1 : i32
    %62 = tpu.dynamic_rotate %59 by %c1_i32_26 dim 1 : vector<8x128xf32>, i32 -> vector<8x128xf32>
    %c127_i32_27 = arith.constant 127 : i32
    %63 = tpu.dynamic_rotate %59 by %c127_i32_27 dim 1 : vector<8x128xf32>, i32 -> vector<8x128xf32>
    %c126_i32_28 = arith.constant 126 : i32
    %64 = tpu.dynamic_rotate %59 by %c126_i32_28 dim 1 : vector<8x128xf32>, i32 -> vector<8x128xf32>
    %65 = tpu.concatenate %61, %62, %59, %63, %64 in 0 : vector<8x128xf32>, vector<8x128xf32>, vector<8x128xf32>, vector<8x128xf32>, vector<8x128xf32> -> vector<40x128xf32>
    %cst_29 = arith.constant dense<0.000000e+00> : vector<8x128xf32>
    %66 = tpu.matmul %60, %65, %cst_29 {dimension_numbers = #tpu.dot_dimension_numbers<[1], [0], [0], [1], [0, 0, 1, 1], [], []>} : vector<8x40xf32>, vector<40x128xf32>, vector<8x128xf32> -> vector<8x128xf32>
    %67 = arith.mulf %66, %66 : vector<8x128xf32>
    %68 = tpu.concatenate %66, %67 in 0 : vector<8x128xf32>, vector<8x128xf32> -> vector<16x128xf32>
    %cst_30 = arith.constant dense<0.000000e+00> : vector<16x2xf32>
    %69 = tpu.matmul %68, %0, %cst_30 {dimension_numbers = #tpu.dot_dimension_numbers<[1], [0], [0], [1], [0, 0, 1, 1], [], []>} : vector<16x128xf32>, vector<128x2xf32>, vector<16x2xf32> -> vector<16x2xf32>
    %70 = vector.extract_strided_slice %69 {offsets = [0, 0], sizes = [8, 2], strides = [1, 1]} : vector<16x2xf32> to vector<8x2xf32>
    %71 = vector.extract_strided_slice %69 {offsets = [8, 0], sizes = [8, 2], strides = [1, 1]} : vector<16x2xf32> to vector<8x2xf32>
    %cst_31 = arith.constant 1.600000e+01 : f32
    %72 = vector.broadcast %cst_31 : f32 to vector<8x2xf32>
    %73 = arith.divf %70, %72 : vector<8x2xf32>
    %cst_32 = arith.constant 1.600000e+01 : f32
    %74 = vector.broadcast %cst_32 : f32 to vector<8x2xf32>
    %75 = arith.divf %71, %74 : vector<8x2xf32>
    %76 = arith.mulf %73, %73 : vector<8x2xf32>
    %77 = arith.subf %75, %76 : vector<8x2xf32>
    %cst_33 = arith.constant 0.000000e+00 : f32
    %78 = vector.broadcast %cst_33 : f32 to vector<8x2xf32>
    %79 = arith.maximumf %77, %78 : vector<8x2xf32>
    %cst_34 = arith.constant 9.99999974E-6 : f32
    %80 = vector.broadcast %cst_34 : f32 to vector<8x2xf32>
    %81 = arith.addf %79, %80 : vector<8x2xf32>
    %82 = math.rsqrt %81 : vector<8x2xf32>
    %83 = vector.broadcast %5 : vector<8x1xf32> to vector<8x2xf32>
    %84 = arith.mulf %83, %82 : vector<8x2xf32>
    %85 = vector.broadcast %5 : vector<8x1xf32> to vector<8x2xf32>
    %86 = arith.mulf %85, %73 : vector<8x2xf32>
    %87 = arith.mulf %86, %82 : vector<8x2xf32>
    %88 = vector.broadcast %6 : vector<8x1xf32> to vector<8x2xf32>
    %89 = arith.subf %88, %87 : vector<8x2xf32>
    %90 = tpu.concatenate %84, %89 in 0 : vector<8x2xf32>, vector<8x2xf32> -> vector<16x2xf32>
    %cst_35 = arith.constant dense<0.000000e+00> : vector<16x128xf32>
    %91 = tpu.matmul %90, %1, %cst_35 {dimension_numbers = #tpu.dot_dimension_numbers<[1], [0], [0], [1], [0, 0, 1, 1], [], []>} : vector<16x2xf32>, vector<2x128xf32>, vector<16x128xf32> -> vector<16x128xf32>
    %92 = vector.extract_strided_slice %91 {offsets = [0, 0], sizes = [8, 128], strides = [1, 1]} : vector<16x128xf32> to vector<8x128xf32>
    %93 = arith.mulf %66, %92 : vector<8x128xf32>
    %94 = vector.extract_strided_slice %91 {offsets = [8, 0], sizes = [8, 128], strides = [1, 1]} : vector<16x128xf32> to vector<8x128xf32>
    %95 = arith.addf %93, %94 : vector<8x128xf32>
    %cst_36 = arith.constant 2.000000e+01 : f32
    %96 = vector.broadcast %cst_36 : f32 to vector<8x128xf32>
    %97 = arith.minimumf %95, %96 : vector<8x128xf32>
    %98 = math.exp %97 : vector<8x128xf32>
    %cst_37 = arith.constant 2.000000e+00 : f32
    %99 = vector.broadcast %cst_37 : f32 to vector<8x128xf32>
    %100 = arith.addf %98, %99 : vector<8x128xf32>
    %101 = arith.mulf %98, %100 : vector<8x128xf32>
    %cst_38 = arith.constant 2.000000e+00 : f32
    %102 = vector.broadcast %cst_38 : f32 to vector<8x128xf32>
    %103 = arith.addf %101, %102 : vector<8x128xf32>
    %104 = arith.divf %101, %103 : vector<8x128xf32>
    %105 = arith.mulf %95, %104 : vector<8x128xf32>
    %c0_39 = arith.constant 0 : index
    %c0_40 = arith.constant 0 : index
    %106 = vector.load %arg8[%c0_39, %c0_40] : memref<8x8xf32, #tpu.memory_space<vmem>>, vector<8x8xf32>
    %cst_41 = arith.constant dense<0.000000e+00> : vector<8x128xf32>
    %107 = tpu.matmul %106, %9, %cst_41 {dimension_numbers = #tpu.dot_dimension_numbers<[1], [0], [0], [1], [0, 0, 1, 1], [], []>} : vector<8x8xf32>, vector<8x128xf32>, vector<8x128xf32> -> vector<8x128xf32>
    %108 = vector.broadcast %7 : vector<8x1xf32> to vector<8x128xf32>
    %109 = arith.addf %107, %108 : vector<8x128xf32>
    %110 = arith.addf %105, %109 : vector<8x128xf32>
    %c0_42 = arith.constant 0 : index
    %c0_43 = arith.constant 0 : index
    %c0_44 = arith.constant 0 : index
    %111 = vector.load %arg9[%c0_42, %c0_43, %c0_44] : memref<1x8x128xf32, #tpu.memory_space<vmem>>, vector<1x8x128xf32>
    %112 = vector.shape_cast %111 : vector<1x8x128xf32> to vector<8x128xf32>
    %113 = vector.shape_cast %110 : vector<8x128xf32> to vector<1x8x128xf32>
    tpu.vector_store %arg9[%c0_42, %c0_43, %c0_44], %113 {strides = array<i32>} : memref<1x8x128xf32, #tpu.memory_space<vmem>>, vector<1x8x128xf32>,
    return
  }
  func.func @transform_0(%arg0: i32) -> (i32, i32, i32) {
    %c0_i32 = arith.constant 0 : i32
    %c0_i32_0 = arith.constant 0 : i32
    %c0_i32_1 = arith.constant 0 : i32
    return %arg0, %c0_i32, %c0_i32_0 : i32, i32, i32
  }
  func.func @transform_1(%arg0: i32) -> (i32, i32, i32) {
    %c0_i32 = arith.constant 0 : i32
    %c0_i32_0 = arith.constant 0 : i32
    %c0_i32_1 = arith.constant 0 : i32
    return %arg0, %c0_i32, %c0_i32_0 : i32, i32, i32
  }
  func.func @transform_2(%arg0: i32) -> (i32, i32) {
    %c0_i32 = arith.constant 0 : i32
    %c0_i32_0 = arith.constant 0 : i32
    %c0_i32_1 = arith.constant 0 : i32
    return %c0_i32, %c0_i32_0 : i32, i32
  }
  func.func @transform_3(%arg0: i32) -> (i32, i32) {
    %c0_i32 = arith.constant 0 : i32
    %c0_i32_0 = arith.constant 0 : i32
    %c0_i32_1 = arith.constant 0 : i32
    return %c0_i32, %c0_i32_0 : i32, i32
  }
  func.func @transform_4(%arg0: i32) -> (i32, i32) {
    %c0_i32 = arith.constant 0 : i32
    %c0_i32_0 = arith.constant 0 : i32
    %c0_i32_1 = arith.constant 0 : i32
    return %c0_i32, %c0_i32_0 : i32, i32
  }
  func.func @transform_5(%arg0: i32) -> (i32, i32) {
    %c0_i32 = arith.constant 0 : i32
    %c0_i32_0 = arith.constant 0 : i32
    %c0_i32_1 = arith.constant 0 : i32
    return %c0_i32, %c0_i32_0 : i32, i32
  }
  func.func @transform_6(%arg0: i32) -> (i32, i32) {
    %c0_i32 = arith.constant 0 : i32
    %c0_i32_0 = arith.constant 0 : i32
    %c0_i32_1 = arith.constant 0 : i32
    return %c0_i32, %c0_i32_0 : i32, i32
  }
  func.func @transform_7(%arg0: i32) -> (i32, i32) {
    %c0_i32 = arith.constant 0 : i32
    %c0_i32_0 = arith.constant 0 : i32
    %c0_i32_1 = arith.constant 0 : i32
    return %c0_i32, %c0_i32_0 : i32, i32
  }
  func.func @transform_8(%arg0: i32) -> (i32, i32, i32) {
    %c0_i32 = arith.constant 0 : i32
    %c0_i32_0 = arith.constant 0 : i32
    %c0_i32_1 = arith.constant 0 : i32
    return %arg0, %c0_i32, %c0_i32_0 : i32, i32, i32
  }
}

</mosaic_0001>

<bundles_post_ra>
// kernel: tpu_custom_call.1
= control target key start
LH: loop header
LB: loop body
LE: loop exit
PB: predicated region body
PF: predicated region fallthrough
CT: control target
= control target key end

     0   :  { %s1002_s29 = smov 126   ;;  %v1003_v1 = vmov 0.0   ;;  %s1004_s30 = smov 1   ;;  %vm1005_vm0 = vmmov 0   ;;  %s1282_s0 = inlined_call_operand.vmem [shape: f32[1,8,128], index: 0, kind: input, shape index: {}]   ;;  %s1283_s1 = inlined_call_operand.vmem [shape: f32[1,8,2], index: 1, kind: input, shape index: {}]   ;;  %s1284_s2 = inlined_call_operand.vmem [shape: f32[128,2], index: 2, kind: input, shape index: {}]   ;;  %s1285_s3 = inlined_call_operand.vmem [shape: f32[2,128], index: 3, kind: input, shape index: {}]   ;;  %s1286_s4 = inlined_call_operand.vmem [shape: f32[8,40], index: 4, kind: input, shape index: {}]   ;;  %s1287_s5 = inlined_call_operand.vmem [shape: f32[8,40], index: 5, kind: input, shape index: {}]   ;;  %s1288_s6 = inlined_call_operand.vmem [shape: f32[8,8], index: 6, kind: input, shape index: {}]   ;;  %s1289_s7 = inlined_call_operand.vmem [shape: f32[8,8], index: 7, kind: input, shape index: {}]   ;;  %s1290_s8 = inlined_call_operand.hbm [shape: f32[1,8,128], index: 8, kind: output, shape index: {}]  }
   0x1   :  { %v1062_v0 = vld [vmem:[%s1282_s0] sm:$0xff]  ;;  %834 = vmatprep.subr.mxu1 %v1003_v1  ;;  %844 = vmatprep.mubr.msk.f32.mxu1 %vm1005_vm0, %v1003_v1 }
   0x2   :  { %56 = vrot.lane.b32.xlu0 %v1062_v0, %s1002_s29  ;;  %52 = vrot.lane.b32.xlu1 %v1062_v0, %s1004_s30 }
   0x3   :  { %13 = vsyncpa [#allocation3], 0  ;;  %s1006_s9 = smov 127   ;;  %s1007_s0 = smov 2   ;;  %v49_v6 = vld [vmem:[%s1286_s4] sm:$0xff]  ;;  %vm58_vm1 = vcmask 326656  }
   0x4   :  { %v1085_v7 = vld [vmem:[%s1284_s2 + $0x78] sm:$0xff]  ;;  %v1091_v8 = vld [vmem:[%s1284_s2 + $0x70] sm:$0xff]  ;;  %v1099_v9 = vld [vmem:[%s1284_s2 + $0x68] sm:$0xff]  ;;  %v1008_v24 = vmov 1   ;;  %v1009_v25 = vmov 2   ;;  %vm236_vm2 = vcmask 1041408  }
   0x5   :  { %v1106_v10 = vld [vmem:[%s1284_s2 + $0x60] sm:$0xff]  ;;  %v1113_v11 = vld [vmem:[%s1284_s2 + $0x58] sm:$0xff]  ;;  %v1120_v12 = vld [vmem:[%s1284_s2 + $0x50] sm:$0xff]  ;;  %962 = vset.pattern.permute.xlu0 %v1008_v24  ;;  %963 = vset.pattern.permute.xlu1 %v1009_v25  ;;  %vm229_vm3 = vcmask 15360   ;;  %vm675_vm4 = vcmask 64512  }
   0x6   :  { %54 = vrot.lane.b32.xlu0 %v1062_v0, %s1006_s9  ;;  %50 = vrot.lane.b32.xlu1 %v1062_v0, %s1007_s0  ;;  %v1127_v13 = vld [vmem:[%s1284_s2 + $0x48] sm:$0xff]  ;;  %v1134_v14 = vld [vmem:[%s1284_s2 + $0x40] sm:$0xff] }
   0x7   :  { %v1141_v15 = vld [vmem:[%s1284_s2 + $0x38] sm:$0xff]  ;;  %v1148_v16 = vld [vmem:[%s1284_s2 + $0x30] sm:$0xff]  ;;  %v1155_v17 = vld [vmem:[%s1284_s2 + $0x28] sm:$0xff] }
   0x8   :  { %v1162_v18 = vld [vmem:[%s1284_s2 + $0x20] sm:$0xff]  ;;  %v1169_v19 = vld [vmem:[%s1284_s2 + $0x18] sm:$0xff]  ;;  %v1176_v20 = vld [vmem:[%s1284_s2 + $0x10] sm:$0xff] }
   0x9   :  { %v1183_v21 = vld [vmem:[%s1284_s2 + $0x8] sm:$0xff]  ;;  %v1192_v22 = vld [vmem:[%s1284_s2] sm:$0xff] }
   0xa   :  { %v1199_v23 = vld [vmem:[%s1288_s6] sm:$0xff] }
   0xb   :  { %218 = vperm.xlu0 %962, %v1199_v23   ;;  %225 = vperm.xlu1 %963, %v1199_v23   ;;  %v46_v29 = vld [vmem:[%s1285_s3] sm:$0x3] }
   0xc   :  { %882 = vmatprep.subr.msk.mxu0 %vm236_vm2, %v46_v29  ;;  %v326_v45 = vld [vmem:[%s1283_s1] sm:$0xff] }
   0xd   :  { %883 = vmatpush3.msk.msra.mxu0 %vm236_vm2, %v46_v29 }
   0xe   :  { %887 = vmatprep.subr.mxu0 %v1003_v1 }
  0x74   :  { %v57_v2 = vpop.permute.xlu0 %56  ;;  %v53_v3 = vpop.permute.xlu1 %52 }
  0x75   :  { %835 = vmatpush3.msra.mxu1 %v57_v2 }
  0x76   :  { %836 = vmatprep.subr.mxu1 %v1003_v1 }
  0x78   :  { %v55_v4 = vpop.permute.xlu0 %54  ;;  %v51_v5 = vpop.permute.xlu1 %50 }
  0x79   :  { %837 = vmatpush3.msra.mxu1 %v55_v4 }
  0x7a   :  { %838 = vmatprep.subr.mxu1 %v1003_v1 }
  0x7b   :  { %839 = vmatpush3.msra.mxu1 %v1062_v0 }
  0x7c   :  { %840 = vmatprep.subr.mxu1 %v1003_v1 }
  0x7d   :  { %841 = vmatpush3.msra.mxu1 %v53_v3  ;;  %v401_v3 = vld [vmem:[%s1287_s5] sm:$0xff] }
  0x7e   :  { %842 = vmatprep.subr.mxu1 %v1003_v1 }
  0x7f   :  { %843 = vmatpush3.msra.mxu1 %v51_v5  ;;  %v1010_v5 = vmov 4  }
  0x80   :  { %845 = vmatmul.mubr.msk.f32.vlgmr.msra.gmra.mxu1 %vm58_vm1, %v49_v6  ;;  %847 = vmatprep.subr.mxu1 %v1085_v7  ;;  %v1011_v6 = vmov 5  }
  0x81   :  { %848 = vmatpush3.msra.mxu1 %v1085_v7  ;;  %964 = vset.pattern.permute.xlu1 %v1010_v5 }
  0x82   :  { %849 = vmatprep.subr.mxu1 %v1091_v8  ;;  %965 = vset.pattern.permute.xlu0 %v1011_v6 }
  0x83   :  { %850 = vmatpush3.msra.mxu1 %v1091_v8 }
  0x84   :  { %851 = vmatprep.subr.mxu1 %v1099_v9 }
  0x85   :  { %852 = vmatpush3.msra.mxu1 %v1099_v9 }
  0x86   :  { %853 = vmatprep.subr.mxu1 %v1106_v10  ;;  %v219_v38 = vpop.permute.xlu0 %218  ;;  %v226_v41 = vpop.permute.xlu1 %225 }
  0x87   :  { %854 = vmatpush3.msra.mxu1 %v1106_v10 }
  0x88   :  { %855 = vmatprep.subr.mxu1 %v1113_v11 }
  0x89   :  { %856 = vmatpush3.msra.mxu1 %v1113_v11 }
  0x8a   :  { %857 = vmatprep.subr.mxu1 %v1120_v12 }
  0x8b   :  { %858 = vmatpush3.msra.mxu1 %v1120_v12 }
  0x8c   :  { %859 = vmatprep.subr.mxu1 %v1127_v13 }
  0x8d   :  { %860 = vmatpush3.msra.mxu1 %v1127_v13 }
  0x8e   :  { %861 = vmatprep.subr.mxu1 %v1134_v14 }
  0x8f   :  { %862 = vmatpush3.msra.mxu1 %v1134_v14 }
  0x90   :  { %863 = vmatprep.subr.mxu1 %v1141_v15 }
  0x91   :  { %864 = vmatpush3.msra.mxu1 %v1141_v15 }
  0x92   :  { %865 = vmatprep.subr.mxu1 %v1148_v16 }
  0x93   :  { %866 = vmatpush3.msra.mxu1 %v1148_v16 }
  0x94   :  { %867 = vmatprep.subr.mxu1 %v1155_v17 }
  0x95   :  { %868 = vmatpush3.msra.mxu1 %v1155_v17 }
  0x96   :  { %869 = vmatprep.subr.mxu1 %v1162_v18 }
  0x97   :  { %870 = vmatpush3.msra.mxu1 %v1162_v18 }
  0x98   :  { %871 = vmatprep.subr.mxu1 %v1169_v19 }
  0x99   :  { %872 = vmatpush3.msra.mxu1 %v1169_v19 }
  0x9a   :  { %873 = vmatprep.subr.mxu1 %v1176_v20 }
  0x9b   :  { %874 = vmatpush3.msra.mxu1 %v1176_v20 }
  0x9c   :  { %875 = vmatprep.subr.mxu1 %v1183_v21 }
  0x9d   :  { %876 = vmatpush3.msra.mxu1 %v1183_v21 }
  0x9e   :  { %877 = vmatprep.subr.mxu1 %v1192_v22 }
  0x9f   :  { %878 = vmatpush3.msra.mxu1 %v1192_v22 }
  0xa0   :  { %940 = vmatprep.subr.msk.mxu1 %vm236_vm2, %v46_v29 }
 0x140   :  { %v128_v26 = vpop.f32.mrf.mxu1 }
 0x141   :  { %v132_v27 = vmul.f32 %v128_v26, %v128_v26  ;;  %879 = vmatprep.mubr.f32.mxu1 %v128_v26 }
 0x142   :  { %v846_v28 = vpop.f32.mrf.mxu1 }
 0x143   :  { %880 = vmatmul.mubr.f32.vlgmr.msra.gmra.mxu1 %v132_v27 }
 0x144   :  { %941 = vmatpush3.msk.msra.mxu1 %vm236_vm2, %v46_v29 }
 0x145   :  { %945 = vmatprep.subr.mxu1 %v1003_v1 }
 0x203   :  { %v881_v30 = vpop.f32.mrf.mxu1 }
 0x204   :  { %v210_v33 = vmul.f32 0.0625, %v881_v30 }
 0x205   :  { %v199_v31 = vpop.f32.mrf.mxu1 }
 0x206   :  { %v209_v32 = vmul.f32 0.0625, %v199_v31 }
 0x208   :  { %v211_v34 = vmul.f32 %v209_v32, %v209_v32  ;;  %v222_v39 = vmul.f32 %v219_v38, %v209_v32 }
 0x20a   :  { %v212_v35 = vsub.f32 %v210_v33, %v211_v34 }
 0x20c   :  { %v213_v36 = vmax.f32 %v212_v35, 0.0 }
 0x20e   :  { %v214_v37 = vadd.f32 1e-05, %v213_v36 }
 0x210   :  { %968 = vrsqrt.f32 %v214_v37 }
 0x21d   :  { %v969_v40 = vpop.eup %968 }
 0x21e   :  { %v223_v42 = vmul.f32 %v969_v40, %v222_v39  ;;  %v221_v43 = vmul.f32 %v969_v40, %v219_v38 }
 0x220   :  { %v228_v44 = vsub.f32 %v226_v41, %v223_v42  ;;  %884 = vmatprep.mubr.msk.f32.mxu0 %vm229_vm3, %v221_v43 }
 0x222   :  { %885 = vmatmul.mubr.msk.f32.vlgmr.msra.gmra.mxu0 %vm229_vm3, %v228_v44 }
 0x223   :  { %888 = vmatpush3.msk.msra.mxu0 %vm236_vm2, %v46_v29  ;;  %889 = vmatprep.mubr.msk.f32.mxu0 %vm1005_vm0, %v1003_v1 }
 0x224   :  { %892 = vmatprep.subr.mxu0 %v1003_v1 }
 0x226   :  { %890 = vmatmul.mubr.msk.f32.vlgmr.msra.gmra.mxu0 %vm229_vm3, %v326_v45 }
 0x227   :  { %902 = vmatprep.mubr.msk.f32.mxu0 %vm1005_vm0, %v1003_v1 }
 0x2e2   :  { %v886_v46 = vpop.f32.mrf.mxu0 }
 0x2e4   :  { %v306_v47 = vpop.f32.mrf.mxu0 }
 0x2e5   :  { %v315_v48 = vmul.f32 %v306_v47, %v128_v26 }
 0x2e6   :  { %v396_v49 = vpop.f32.mrf.mxu0 }
 0x2e7   :  { %v316_v50 = vadd.f32 %v886_v46, %v315_v48 }
 0x2e8   :  { %v891_v51 = vpop.f32.mrf.mxu0 }
 0x2e9   :  { %v317_v52 = vmin.f32 %v316_v50, 20.0 }
 0x2eb   :  { %v318_v53 = vmul.f32 1.442695, %v317_v52 }
 0x2ed   :  { %970 = vpow2.f32 %v318_v53 }
 0x2fa   :  { %v971_v54 = vpop.eup %970 }
 0x2fb   :  { %v320_v55 = vadd.f32 2.0, %v971_v54 }
 0x2fd   :  { %v321_v56 = vmul.f32 %v971_v54, %v320_v55 }
 0x2ff   :  { %v322_v57 = vadd.f32 2.0, %v321_v56 }
 0x301   :  { %972 = vrcp.f32 %v322_v57 }
 0x30e   :  { %v973_v58 = vpop.eup %972 }
 0x30f   :  { %v324_v59 = vmul.f32 %v973_v58, %v321_v56 }
 0x311   :  { %v325_v60 = vmul.f32 %v324_v59, %v316_v50 }
 0x313   :  { %v400_v61 = vadd.f32 %v396_v49, %v325_v60 }
 0x315   :  { %406 = vrot.lane.b32.xlu0 %v400_v61, %s1006_s9  ;;  %408 = vrot.lane.b32.xlu1 %v400_v61, %s1002_s29 }
 0x319   :  { %402 = vrot.lane.b32.xlu0 %v400_v61, %s1007_s0  ;;  %404 = vrot.lane.b32.xlu1 %v400_v61, %s1004_s30 }
 0x31d   :  { %567 = vperm.xlu1 %964, %v1199_v23   ;;  %574 = vperm.xlu0 %965, %v1199_v23  }
 0x387   :  { %v409_v62 = vpop.permute.xlu1 %408  ;;  %v407_v63 = vpop.permute.xlu0 %406 }
 0x388   :  { %893 = vmatpush3.msra.mxu0 %v409_v62 }
 0x389   :  { %894 = vmatprep.subr.mxu0 %v1003_v1 }
 0x38a   :  { %895 = vmatpush3.msra.mxu0 %v407_v63 }
 0x38b   :  { %896 = vmatprep.subr.mxu0 %v1003_v1  ;;  %v405_v2 = vpop.permute.xlu1 %404  ;;  %v403_v4 = vpop.permute.xlu0 %402 }
 0x38c   :  { %897 = vmatpush3.msra.mxu0 %v400_v61 }
 0x38d   :  { %898 = vmatprep.subr.mxu0 %v1003_v1 }
 0x38e   :  { %899 = vmatpush3.msra.mxu0 %v405_v2 }
 0x38f   :  { %900 = vmatprep.subr.mxu0 %v1003_v1 }
 0x390   :  { %901 = vmatpush3.msra.mxu0 %v403_v4 }
 0x391   :  { %903 = vmatmul.mubr.msk.f32.vlgmr.msra.gmra.mxu0 %vm58_vm1, %v401_v3  ;;  %905 = vmatprep.subr.mxu0 %v1085_v7 }
 0x392   :  { %906 = vmatpush3.msra.mxu0 %v1085_v7 }
 0x393   :  { %907 = vmatprep.subr.mxu0 %v1091_v8 }
 0x394   :  { %908 = vmatpush3.msra.mxu0 %v1091_v8 }
 0x395   :  { %909 = vmatprep.subr.mxu0 %v1099_v9 }
 0x396   :  { %910 = vmatpush3.msra.mxu0 %v1099_v9 }
 0x397   :  { %911 = vmatprep.subr.mxu0 %v1106_v10 }
 0x398   :  { %912 = vmatpush3.msra.mxu0 %v1106_v10  ;;  %v1012_v10 = vmov 6  }
 0x399   :  { %913 = vmatprep.subr.mxu0 %v1113_v11  ;;  %966 = vset.pattern.permute.xlu1 %v1012_v10 }
 0x39a   :  { %914 = vmatpush3.msra.mxu0 %v1113_v11  ;;  %967 = vset.pattern.permute.xlu0 %v1012_v10 }
 0x39b   :  { %915 = vmatprep.subr.mxu0 %v1120_v12  ;;  %672 = vperm.xlu1 %966, %v1199_v23   ;;  %v670_v23 = vld [vmem:[%s1289_s7] sm:$0xff]  ;;  %s1013_s7 = smov [#allocation2]  }
 0x39c   :  { %916 = vmatpush3.msra.mxu0 %v1120_v12  ;;  %s757_s30 = sshll.u32 %s1013_s7, 4  ;;  %s758_s30 = int_to_ptr.vmem [resolvable:$true] %s757_s30 }
 0x39d   :  { %917 = vmatprep.subr.mxu0 %v1127_v13  ;;  %s980_s0 = scalar_lea.vmem %s758_s30, 128  ;;  %p985_p1 = scmp.lt.s32.totalorder %s758_s30, %s758_s30 }
 0x39e   :  { %918 = vmatpush3.msra.mxu0 %v1127_v13  ;;  %p981_p0 = scmp.ne.s32.totalorder %s758_s30, %s980_s0  ;;  %p986_p2 = scmp.lt.s32.totalorder %s980_s0, %s980_s0 }
 0x39f   :  { %919 = vmatprep.subr.mxu0 %v1134_v14 }
 0x3a0   :  { %920 = vmatpush3.msra.mxu0 %v1134_v14  ;;  %p987_p3 = por %p986_p2, %p985_p1 }
 0x3a1   :  { %921 = vmatprep.subr.mxu0 %v1141_v15 }
 0x3a2   :  { %922 = vmatpush3.msra.mxu0 %v1141_v15  ;;  %p988_p4 = pnand %p987_p3, %p981_p0 }
 0x3a3   :  { %923 = vmatprep.subr.mxu0 %v1148_v16 }
 0x3a4   :  { %924 = vmatpush3.msra.mxu0 %v1148_v16 }
 0x3a5   :  { %925 = vmatprep.subr.mxu0 %v1155_v17 }
 0x3a6   :  { %926 = vmatpush3.msra.mxu0 %v1155_v17 }
 0x3a7   :  { %927 = vmatprep.subr.mxu0 %v1162_v18 }
 0x3a8   :  { %928 = vmatpush3.msra.mxu0 %v1162_v18 }
 0x3a9   :  { %929 = vmatprep.subr.mxu0 %v1169_v19 }
 0x3aa   :  { %930 = vmatpush3.msra.mxu0 %v1169_v19  ;;  %v568_v19 = vpop.permute.xlu1 %567 }
 0x3ab   :  { %931 = vmatprep.subr.mxu0 %v1176_v20 }
 0x3ac   :  { %932 = vmatpush3.msra.mxu0 %v1176_v20 }
 0x3ad   :  { %933 = vmatprep.subr.mxu0 %v1183_v21 }
 0x3ae   :  { %934 = vmatpush3.msra.mxu0 %v1183_v21 }
 0x3af   :  { %935 = vmatprep.subr.mxu0 %v1192_v22 }
 0x3b0   :  { %936 = vmatpush3.msra.mxu0 %v1192_v22  ;;  %v575_v22 = vpop.permute.xlu0 %574 }
 0x451   :  { %v479_v7 = vpop.f32.mrf.mxu0 }
 0x452   :  { %v483_v8 = vmul.f32 %v479_v7, %v479_v7  ;;  %937 = vmatprep.mubr.f32.mxu0 %v479_v7 }
 0x453   :  { %v904_v9 = vpop.f32.mrf.mxu0 }
 0x454   :  { %938 = vmatmul.mubr.f32.vlgmr.msra.gmra.mxu0 %v483_v8 }
 0x514   :  { %v939_v11 = vpop.f32.mrf.mxu0 }
 0x515   :  { %v560_v14 = vmul.f32 0.0625, %v939_v11 }
 0x516   :  { %v550_v12 = vpop.f32.mrf.mxu0 }
 0x517   :  { %v559_v13 = vmul.f32 0.0625, %v550_v12 }
 0x519   :  { %v561_v15 = vmul.f32 %v559_v13, %v559_v13  ;;  %v571_v20 = vmul.f32 %v568_v19, %v559_v13 }
 0x51b   :  { %v562_v16 = vsub.f32 %v560_v14, %v561_v15 }
 0x51d   :  { %v563_v17 = vmax.f32 %v562_v16, 0.0 }
 0x51f   :  { %v564_v18 = vadd.f32 1e-05, %v563_v17 }
 0x521   :  { %974 = vrsqrt.f32 %v564_v18 }
 0x52e   :  { %v975_v21 = vpop.eup %974 }
 0x52f   :  { %v570_v24 = vmul.f32 %v975_v21, %v568_v19  ;;  %v572_v25 = vmul.f32 %v975_v21, %v571_v20 }
 0x531   :  { %v577_v26 = vsub.f32 %v575_v22, %v572_v25  ;;  %942 = vmatprep.mubr.msk.f32.mxu1 %vm229_vm3, %v570_v24 }
 0x533   :  { %943 = vmatmul.mubr.msk.f32.vlgmr.msra.gmra.mxu1 %vm229_vm3, %v577_v26 }
 0x534   :  { %946 = vmatpush3.msra.mxu1 %v1062_v0  ;;  %947 = vmatprep.mubr.msk.f32.mxu1 %vm1005_vm0, %v1003_v1  ;;  %v673_v1 = vpop.permute.xlu1 %672 }
 0x537   :  { %948 = vmatmul.mubr.msk.f32.vlgmr.msra.gmra.mxu1 %vm675_vm4, %v670_v23 }
 0x5f3   :  { %v944_v27 = vpop.f32.mrf.mxu1 }
 0x5f5   :  { %v650_v28 = vpop.f32.mrf.mxu1 }
 0x5f6   :  { %v659_v29 = vmul.f32 %v650_v28, %v479_v7 }
 0x5f7   :  { %v745_v30 = vpop.f32.mrf.mxu1 }
 0x5f8   :  { %v660_v31 = vadd.f32 %v944_v27, %v659_v29  ;;  %v746_v39 = vadd.f32 %v745_v30, %v673_v1 }
 0x5f9   :  { %v949_v32 = vpop.f32.mrf.mxu1 }
 0x5fa   :  { %v661_v33 = vmin.f32 %v660_v31, 20.0 }
 0x5fc   :  { %v662_v34 = vmul.f32 1.442695, %v661_v33 }
 0x5fe   :  { %976 = vpow2.f32 %v662_v34 }
 0x60b   :  { %v977_v35 = vpop.eup %976 }
 0x60c   :  { %v664_v0 = vadd.f32 2.0, %v977_v35 }
 0x60e   :  { %v665_v36 = vmul.f32 %v977_v35, %v664_v0 }
 0x610   :  { %v666_v37 = vadd.f32 2.0, %v665_v36 }
 0x612   :  { %978 = vrcp.f32 %v666_v37 }
 0x61f   :  { %v979_v38 = vpop.eup %978 }
 0x620   :  { %v668_v40 = vmul.f32 %v979_v38, %v665_v36 }
 0x622   :  { %v669_v41 = vmul.f32 %v668_v40, %v660_v31 }
 0x624   :  { %v749_v42 = vadd.f32 %v746_v39, %v669_v41 }
 0x626   :  { %750 = vst [vmem:[#allocation2] sm:$0xff] %v749_v42 }
 0x627   :  { %991 = shalt.err (!%p988_p4)
}
 0x628   :  { %760 = dma.vmem_to_hbm [thread:$0]  %s758_s30, 128, %s1290_s8, [#allocation3]  }
 0x629   :  { %1000 = dma.done.wait [#allocation3], 128  }
 0x62a   :  { %1001 = vsyncadd [#allocation3], 4294967168 }
 0x62b   :  { %764 = vsyncpa [#allocation3], 1 }

</bundles_post_ra>
